<compile_context>
chip_gen: v6e
topology: v6e:2x2x1
jax: 0.10.0
libtpu: 0.0.40
codegen_flags: <defaults>
</compile_context>

<pallas_src>
import functools

import jax
import jax.numpy as jnp
from jax.experimental import pallas as pl
from jax.experimental.pallas import tpu as pltpu

# Loss weights (module has no learned parameters; defaults from __init__).
COEF = 1.0
IGR_WEIGHT = 0.1
MASK_WEIGHT = 0.1
DEPTH_WEIGHT = 0.1
# NB: the PyTorch __init__ does `self.floor_weight = depth_weight` (replicated verbatim).
FLOOR_WEIGHT = DEPTH_WEIGHT
CURVATURE_WEIGHT = 0.0005

_LANES = 128
_CHUNK = 16                      # rows per inner accumulation chunk (bf16-tile friendly)
_LOSS_KEYS = ('color_loss', 'normal_loss', 'hessians',
              'mask_error', 'sfm_depth_loss', 'floor_normal_error')

# Row order of the packed channel-major stream slab.
_R_MASK, _R_GRAD, _R_MASKERR, _R_SFM, _R_FLOOR = range(5)
_R_CH0 = 5                       # color / target / hessian channels start here


def _round_up(x, m):
    return ((x + m - 1) // m) * m


def _neuconw_loss_kernel(n_ref, s_ref, out_ref, acc_ref, *, cc, ch):
    """s_ref: (R, block_rows, 128) packed streams; acc_ref: (7, _CHUNK, 128) f32."""
    f32 = jnp.float32
    pid = pl.program_id(0)
    c0 = _R_CH0                 # color channel rows
    t0 = _R_CH0 + cc            # target channel rows
    h0 = _R_CH0 + 2 * cc        # hessian channel rows

    @pl.when(pid == 0)
    def _init():
        acc_ref[...] = jnp.zeros_like(acc_ref)

    n_chunks = s_ref.shape[1] // _CHUNK

    def chunk_body(i, carry):
        a_color, a_mask, a_grad, a_lap, a_maskerr, a_sfm, a_floor = carry
        r = pl.multiple_of(i * _CHUNK, _CHUNK)
        sl = pl.ds(r, _CHUNK)

        m = s_ref[_R_MASK, sl, :].astype(f32)
        # |(c - t) * m| == |c - t| * |m| for any real m; hoisting the (abs'd)
        # mask multiply out of the channel loop is exact and saves VALU work.
        cab = jnp.abs(s_ref[c0, sl, :].astype(f32) - s_ref[t0, sl, :].astype(f32))
        for c in range(1, cc):
            cab = cab + jnp.abs(s_ref[c0 + c, sl, :].astype(f32)
                                - s_ref[t0 + c, sl, :].astype(f32))

        # TODO(synk): curvature_loss() body is not in the snippet; using the
        # standard NeuconW laplacian form: mean(|hessians.sum(-1)|).
        lap = s_ref[h0, sl, :].astype(f32)
        for c in range(1, ch):
            lap = lap + s_ref[h0 + c, sl, :].astype(f32)

        return (a_color + cab * jnp.abs(m),
                a_mask + m,
                a_grad + s_ref[_R_GRAD, sl, :].astype(f32),
                a_lap + jnp.abs(lap),
                a_maskerr + s_ref[_R_MASKERR, sl, :].astype(f32),
                a_sfm + s_ref[_R_SFM, sl, :].astype(f32),
                a_floor + s_ref[_R_FLOOR, sl, :].astype(f32))

    # Carry the 7 per-lane accumulators (7 x 2 vregs) through the chunk loop;
    # the only XLU reductions happen once in the finalize branch.
    carry = jax.lax.fori_loop(0, n_chunks, chunk_body,
                              tuple(acc_ref[i] for i in range(7)))
    for i in range(7):
        acc_ref[i] = carry[i]

    @pl.when(pid == pl.num_programs(0) - 1)
    def _finalize():
        s_color = jnp.sum(acc_ref[0])
        s_mask = jnp.sum(acc_ref[1])
        s_grad = jnp.sum(acc_ref[2])
        s_lap = jnp.sum(acc_ref[3])
        s_maskerr = jnp.sum(acc_ref[4])
        s_sfm = jnp.sum(acc_ref[5])
        s_floor = jnp.sum(acc_ref[6])

        inv_n = 1.0 / n_ref[0].astype(f32)     # means use the ORIGINAL N, not padded
        mask_sum = s_mask + 1e-5
        losses = (
            COEF * (s_color / mask_sum),
            COEF * IGR_WEIGHT * s_grad * inv_n,
            COEF * CURVATURE_WEIGHT * s_lap * inv_n,
            COEF * MASK_WEIGHT * s_maskerr * inv_n,
            COEF * DEPTH_WEIGHT * s_sfm * inv_n,
            COEF * FLOOR_WEIGHT * s_floor * inv_n,
        )

        lane = jax.lax.broadcasted_iota(jnp.int32, out_ref.shape, 1)
        out = jnp.zeros(out_ref.shape, f32)
        for i, v in enumerate(losses):
            out = jnp.where(lane == i, v, out)
        out_ref[...] = out


def neuconw_loss(inputs, targets, masks=None, *, block_rows=512):
    """Pallas implementation of NeuconWLoss.forward.

    TODO(synk): config.NEUCONW.* gating is not available here; all optional loss
    branches (mask_error / sfm_depth_loss / floor_normal_error) are computed.
    """
    n = int(targets.shape[0])
    cc = int(targets.shape[1])
    ch = int(inputs['hessians'].shape[1])
    if masks is None:
        masks = jnp.ones((n, 1), targets.dtype)

    # Keep the caller's storage dtype across the HBM->VMEM DMA (bf16 stays bf16);
    # upcast to f32 happens per chunk inside the kernel, accumulation is f32.
    dtype = jnp.result_type(masks.dtype, targets.dtype, inputs['color'].dtype,
                            inputs['gradient_error'].dtype, inputs['mask_error'].dtype,
                            inputs['sfm_depth_loss'].dtype,
                            inputs['floor_normal_error'].dtype,
                            inputs['hessians'].dtype)

    rows = pl.cdiv(n, _LANES)                                  # 128-wide rows of rays
    block_rows = _round_up(max(_CHUNK, min(block_rows, _round_up(rows, _CHUNK))), _CHUNK)
    rows_p = _round_up(rows, block_rows)
    num_tiles = rows_p // block_rows

    def _row(x):                                               # one scalar per ray -> (1, N)
        return x.reshape(1, -1).astype(dtype)

    # Single fused packing pass: every per-ray stream into one channel-major
    # lane-dense slab (one concat+pad+reshape, one HBM materialization).
    packed = jnp.concatenate(
        [_row(masks),
         _row(inputs['gradient_error']),
         _row(inputs['mask_error']),
         _row(inputs['sfm_depth_loss']),
         _row(inputs['floor_normal_error']),
         inputs['color'].T.astype(dtype),
         targets.T.astype(dtype),
         inputs['hessians'].T.astype(dtype)],
        axis=0)                                                # (R, N)
    r_total = packed.shape[0]
    packed = jnp.pad(packed, ((0, 0), (0, rows_p * _LANES - n)))
    packed = packed.reshape(r_total, rows_p, _LANES)           # (R, rows_p, 128)

    # Only raise the scoped-VMEM limit if an oversized user tile needs it
    # (default 512-row f32 tile is ~7 MiB double-buffered -> fits v5e's 16 MiB).
    block_bytes = r_total * block_rows * _LANES * packed.dtype.itemsize
    vmem_limit = None
    if 2 * block_bytes + (2 << 20) > (16 << 20):
        vmem_limit = min(2 * block_bytes + (8 << 20), 48 << 20)   # v7x-safe headroom

    kernel = functools.partial(_neuconw_loss_kernel, cc=cc, ch=ch)
    out = pl.pallas_call(
        kernel,
        out_shape=jax.ShapeDtypeStruct((8, _LANES), jnp.float32),
        grid_spec=pltpu.PrefetchScalarGridSpec(
            num_scalar_prefetch=1,                  # n_rays lives in SMEM, not baked in
            grid=(num_tiles,),
            in_specs=[pl.BlockSpec((r_total, block_rows, _LANES),
                                   lambda i, n_s: (0, i, 0))],
            out_specs=pl.BlockSpec((8, _LANES), lambda i, n_s: (0, 0)),
            scratch_shapes=[pltpu.VMEM((7, _CHUNK, _LANES), jnp.float32)],
        ),
        compiler_params=pltpu.CompilerParams(
            dimension_semantics=("arbitrary",),     # sequential: scratch accumulator
            vmem_limit_bytes=vmem_limit),
        cost_estimate=pl.CostEstimate(
            flops=(3 * cc + ch + 12) * rows_p * _LANES,
            transcendentals=0,
            bytes_accessed=int(packed.size) * packed.dtype.itemsize + 8 * _LANES * 4),
    )(jnp.array([n], jnp.int32), packed)

    vals = out[0, :len(_LOSS_KEYS)]                 # single slice read of the slab
    return {k: vals[i] for i, k in enumerate(_LOSS_KEYS)}


def _reference_loss(inputs, targets, masks):
    """Pure-JAX (f32) reference mirroring the PyTorch forward."""
    f32 = jnp.float32
    masks = masks.astype(f32)
    mask_sum = jnp.sum(masks) + 1e-5
    color_error = (inputs['color'].astype(f32) - targets.astype(f32)) * masks
    ret = {
        'color_loss': jnp.sum(jnp.abs(color_error)) / mask_sum,
        'normal_loss': IGR_WEIGHT * jnp.mean(inputs['gradient_error'].astype(f32)),
        'hessians': CURVATURE_WEIGHT
                    * jnp.mean(jnp.abs(jnp.sum(inputs['hessians'].astype(f32), axis=-1))),
        'mask_error': MASK_WEIGHT * jnp.mean(inputs['mask_error'].astype(f32)),
        'sfm_depth_loss': DEPTH_WEIGHT * jnp.mean(inputs['sfm_depth_loss'].astype(f32)),
        'floor_normal_error': FLOOR_WEIGHT * jnp.mean(inputs['floor_normal_error'].astype(f32)),
    }
    return {k: COEF * v for k, v in ret.items()}


if __name__ == "__main__":
    def make_inputs(key, n_rays, dtype):
        ks = jax.random.split(key, 8)
        targets = jax.random.uniform(ks[0], (n_rays, 3), jnp.float32).astype(dtype)
        masks = (jax.random.uniform(ks[1], (n_rays, 1)) > 0.3).astype(dtype)
        inputs = {
            'color': jax.random.uniform(ks[2], (n_rays, 3), jnp.float32).astype(dtype),
            'gradient_error': jax.random.uniform(ks[3], (n_rays, 1), jnp.float32).astype(dtype),
            'hessians': jax.random.normal(ks[4], (n_rays, 3), jnp.float32).astype(dtype),
            'mask_error': jax.random.uniform(ks[5], (n_rays, 1), jnp.float32).astype(dtype),
            'sfm_depth_loss': jax.random.uniform(ks[6], (n_rays, 1), jnp.float32).astype(dtype),
            'floor_normal_error': jax.random.uniform(ks[7], (n_rays, 1), jnp.float32).astype(dtype),
        }
        return inputs, targets, masks

    # 1) f32, single tile, N not a multiple of 128 (exercises zero-padding).
    inputs, targets, masks = make_inputs(jax.random.PRNGKey(0), 300, jnp.float32)
    out = jax.block_until_ready(neuconw_loss(inputs, targets, masks))
    ref = _reference_loss(inputs, targets, masks)
    for k in _LOSS_KEYS:
        assert jnp.allclose(out[k], ref[k], rtol=1e-4, atol=1e-5), (k, out[k], ref[k])

    # 2) multi-tile streaming reduction (small block_rows forces a multi-step grid).
    inputs, targets, masks = make_inputs(jax.random.PRNGKey(0), 2600, jnp.float32)
    out = jax.block_until_ready(neuconw_loss(inputs, targets, masks, block_rows=16))
    ref = _reference_loss(inputs, targets, masks)
    for k in _LOSS_KEYS:
        assert jnp.allclose(out[k], ref[k], rtol=1e-4, atol=1e-5), (k, out[k], ref[k])

    # 3) bf16 ingest (storage dtype preserved across the DMA, f32 math in-kernel).
    inputs, targets, masks = make_inputs(jax.random.PRNGKey(0), 512, jnp.bfloat16)
    out = jax.block_until_ready(neuconw_loss(inputs, targets, masks))
    ref = _reference_loss(inputs, targets, masks)
    for k in _LOSS_KEYS:
        assert jnp.allclose(out[k], ref[k], rtol=1e-3, atol=1e-5), (k, out[k], ref[k])

    # 4) masks=None default path.
    out = jax.block_until_ready(neuconw_loss(inputs, targets))

    print("KERNEL_OK")
</pallas_src>

<mosaic_0001>
module attributes {stable_mosaic.version = 11 : i64} {
  func.func @_neuconw_loss_kernel(%arg0: i32, %arg1: memref<1xi32, #tpu.memory_space<smem>>, %arg2: memref<14x16x128xf32, #tpu.memory_space<vmem>>, %arg3: memref<8x128xf32, #tpu.memory_space<vmem>>, %arg4: memref<7x16x128xf32, #tpu.memory_space<vmem>>) attributes {dimension_semantics = [#tpu.dimension_semantics<arbitrary>], iteration_bounds = array<i64: 1>, scalar_prefetch = 1 : i64, scratch_operands = 1 : i64, tpu.core_type = #tpu.core_type<tc>, window_params = [{transform_indices = @transform_0, window_bounds = array<i64: 14, 16, 128>}, {pipeline_mode = #tpu.pipeline_mode<synchronous>, transform_indices = @transform_1, window_bounds = array<i64: 8, 128>}]} {
    %c0_i32 = arith.constant 0 : i32
    %0 = arith.cmpi eq, %arg0, %c0_i32 : i32
    %1 = arith.extui %0 : i1 to i32
    %c0_i32_0 = arith.constant 0 : i32
    %2 = arith.cmpi ne, %1, %c0_i32_0 : i32
    scf.if %2 {
      %cst = arith.constant 0.000000e+00 : f32
      %105 = vector.broadcast %cst : f32 to vector<7x16x128xf32>
      %c0_60 = arith.constant 0 : index
      %c0_61 = arith.constant 0 : index
      %c0_62 = arith.constant 0 : index
      %106 = vector.load %arg4[%c0_60, %c0_61, %c0_62] : memref<7x16x128xf32, #tpu.memory_space<vmem>>, vector<7x16x128xf32>
      tpu.vector_store %arg4[%c0_60, %c0_61, %c0_62], %105 {strides = array<i32>} : memref<7x16x128xf32, #tpu.memory_space<vmem>>, vector<7x16x128xf32>,
    } else {
    }
    %c0 = arith.constant 0 : index
    %c0_1 = arith.constant 0 : index
    %c0_2 = arith.constant 0 : index
    %3 = vector.load %arg4[%c0, %c0_1, %c0_2] : memref<7x16x128xf32, #tpu.memory_space<vmem>>, vector<1x16x128xf32>
    %4 = vector.shape_cast %3 : vector<1x16x128xf32> to vector<16x128xf32>
    %c1 = arith.constant 1 : index
    %c0_3 = arith.constant 0 : index
    %c0_4 = arith.constant 0 : index
    %5 = vector.load %arg4[%c1, %c0_3, %c0_4] : memref<7x16x128xf32, #tpu.memory_space<vmem>>, vector<1x16x128xf32>
    %6 = vector.shape_cast %5 : vector<1x16x128xf32> to vector<16x128xf32>
    %c2 = arith.constant 2 : index
    %c0_5 = arith.constant 0 : index
    %c0_6 = arith.constant 0 : index
    %7 = vector.load %arg4[%c2, %c0_5, %c0_6] : memref<7x16x128xf32, #tpu.memory_space<vmem>>, vector<1x16x128xf32>
    %8 = vector.shape_cast %7 : vector<1x16x128xf32> to vector<16x128xf32>
    %c3 = arith.constant 3 : index
    %c0_7 = arith.constant 0 : index
    %c0_8 = arith.constant 0 : index
    %9 = vector.load %arg4[%c3, %c0_7, %c0_8] : memref<7x16x128xf32, #tpu.memory_space<vmem>>, vector<1x16x128xf32>
    %10 = vector.shape_cast %9 : vector<1x16x128xf32> to vector<16x128xf32>
    %c4 = arith.constant 4 : index
    %c0_9 = arith.constant 0 : index
    %c0_10 = arith.constant 0 : index
    %11 = vector.load %arg4[%c4, %c0_9, %c0_10] : memref<7x16x128xf32, #tpu.memory_space<vmem>>, vector<1x16x128xf32>
    %12 = vector.shape_cast %11 : vector<1x16x128xf32> to vector<16x128xf32>
    %c5 = arith.constant 5 : index
    %c0_11 = arith.constant 0 : index
    %c0_12 = arith.constant 0 : index
    %13 = vector.load %arg4[%c5, %c0_11, %c0_12] : memref<7x16x128xf32, #tpu.memory_space<vmem>>, vector<1x16x128xf32>
    %14 = vector.shape_cast %13 : vector<1x16x128xf32> to vector<16x128xf32>
    %c6 = arith.constant 6 : index
    %c0_13 = arith.constant 0 : index
    %c0_14 = arith.constant 0 : index
    %15 = vector.load %arg4[%c6, %c0_13, %c0_14] : memref<7x16x128xf32, #tpu.memory_space<vmem>>, vector<1x16x128xf32>
    %16 = vector.shape_cast %15 : vector<1x16x128xf32> to vector<16x128xf32>
    %c0_i32_15 = arith.constant 0 : i32
    %c16_i32 = arith.constant 16 : i32
    %17 = arith.muli %c0_i32_15, %c16_i32 : i32
    %18 = tpu.assume_multiple %17, 16 : i32
    %c0_16 = arith.constant 0 : index
    %19 = arith.index_cast %18 : i32 to index
    %c0_17 = arith.constant 0 : index
    %20 = vector.load %arg2[%c0_16, %19, %c0_17] : memref<14x16x128xf32, #tpu.memory_space<vmem>>, vector<1x16x128xf32>
    %21 = vector.shape_cast %20 : vector<1x16x128xf32> to vector<16x128xf32>
    %c5_18 = arith.constant 5 : index
    %22 = arith.index_cast %18 : i32 to index
    %c0_19 = arith.constant 0 : index
    %23 = vector.load %arg2[%c5_18, %22, %c0_19] : memref<14x16x128xf32, #tpu.memory_space<vmem>>, vector<1x16x128xf32>
    %24 = vector.shape_cast %23 : vector<1x16x128xf32> to vector<16x128xf32>
    %c8 = arith.constant 8 : index
    %25 = arith.index_cast %18 : i32 to index
    %c0_20 = arith.constant 0 : index
    %26 = vector.load %arg2[%c8, %25, %c0_20] : memref<14x16x128xf32, #tpu.memory_space<vmem>>, vector<1x16x128xf32>
    %27 = vector.shape_cast %26 : vector<1x16x128xf32> to vector<16x128xf32>
    %28 = arith.subf %24, %27 : vector<16x128xf32>
    %29 = math.absf %28 : vector<16x128xf32>
    %c6_21 = arith.constant 6 : index
    %30 = arith.index_cast %18 : i32 to index
    %c0_22 = arith.constant 0 : index
    %31 = vector.load %arg2[%c6_21, %30, %c0_22] : memref<14x16x128xf32, #tpu.memory_space<vmem>>, vector<1x16x128xf32>
    %32 = vector.shape_cast %31 : vector<1x16x128xf32> to vector<16x128xf32>
    %c9 = arith.constant 9 : index
    %33 = arith.index_cast %18 : i32 to index
    %c0_23 = arith.constant 0 : index
    %34 = vector.load %arg2[%c9, %33, %c0_23] : memref<14x16x128xf32, #tpu.memory_space<vmem>>, vector<1x16x128xf32>
    %35 = vector.shape_cast %34 : vector<1x16x128xf32> to vector<16x128xf32>
    %36 = arith.subf %32, %35 : vector<16x128xf32>
    %37 = math.absf %36 : vector<16x128xf32>
    %38 = arith.addf %29, %37 : vector<16x128xf32>
    %c7 = arith.constant 7 : index
    %39 = arith.index_cast %18 : i32 to index
    %c0_24 = arith.constant 0 : index
    %40 = vector.load %arg2[%c7, %39, %c0_24] : memref<14x16x128xf32, #tpu.memory_space<vmem>>, vector<1x16x128xf32>
    %41 = vector.shape_cast %40 : vector<1x16x128xf32> to vector<16x128xf32>
    %c10 = arith.constant 10 : index
    %42 = arith.index_cast %18 : i32 to index
    %c0_25 = arith.constant 0 : index
    %43 = vector.load %arg2[%c10, %42, %c0_25] : memref<14x16x128xf32, #tpu.memory_space<vmem>>, vector<1x16x128xf32>
    %44 = vector.shape_cast %43 : vector<1x16x128xf32> to vector<16x128xf32>
    %45 = arith.subf %41, %44 : vector<16x128xf32>
    %46 = math.absf %45 : vector<16x128xf32>
    %47 = arith.addf %38, %46 : vector<16x128xf32>
    %c11 = arith.constant 11 : index
    %48 = arith.index_cast %18 : i32 to index
    %c0_26 = arith.constant 0 : index
    %49 = vector.load %arg2[%c11, %48, %c0_26] : memref<14x16x128xf32, #tpu.memory_space<vmem>>, vector<1x16x128xf32>
    %50 = vector.shape_cast %49 : vector<1x16x128xf32> to vector<16x128xf32>
    %c12 = arith.constant 12 : index
    %51 = arith.index_cast %18 : i32 to index
    %c0_27 = arith.constant 0 : index
    %52 = vector.load %arg2[%c12, %51, %c0_27] : memref<14x16x128xf32, #tpu.memory_space<vmem>>, vector<1x16x128xf32>
    %53 = vector.shape_cast %52 : vector<1x16x128xf32> to vector<16x128xf32>
    %54 = arith.addf %50, %53 : vector<16x128xf32>
    %c13 = arith.constant 13 : index
    %55 = arith.index_cast %18 : i32 to index
    %c0_28 = arith.constant 0 : index
    %56 = vector.load %arg2[%c13, %55, %c0_28] : memref<14x16x128xf32, #tpu.memory_space<vmem>>, vector<1x16x128xf32>
    %57 = vector.shape_cast %56 : vector<1x16x128xf32> to vector<16x128xf32>
    %58 = arith.addf %54, %57 : vector<16x128xf32>
    %59 = math.absf %21 : vector<16x128xf32>
    %60 = arith.mulf %47, %59 : vector<16x128xf32>
    %61 = arith.addf %4, %60 : vector<16x128xf32>
    %62 = arith.addf %6, %21 : vector<16x128xf32>
    %c1_29 = arith.constant 1 : index
    %63 = arith.index_cast %18 : i32 to index
    %c0_30 = arith.constant 0 : index
    %64 = vector.load %arg2[%c1_29, %63, %c0_30] : memref<14x16x128xf32, #tpu.memory_space<vmem>>, vector<1x16x128xf32>
    %65 = vector.shape_cast %64 : vector<1x16x128xf32> to vector<16x128xf32>
    %66 = arith.addf %8, %65 : vector<16x128xf32>
    %67 = math.absf %58 : vector<16x128xf32>
    %68 = arith.addf %10, %67 : vector<16x128xf32>
    %c2_31 = arith.constant 2 : index
    %69 = arith.index_cast %18 : i32 to index
    %c0_32 = arith.constant 0 : index
    %70 = vector.load %arg2[%c2_31, %69, %c0_32] : memref<14x16x128xf32, #tpu.memory_space<vmem>>, vector<1x16x128xf32>
    %71 = vector.shape_cast %70 : vector<1x16x128xf32> to vector<16x128xf32>
    %72 = arith.addf %12, %71 : vector<16x128xf32>
    %c3_33 = arith.constant 3 : index
    %73 = arith.index_cast %18 : i32 to index
    %c0_34 = arith.constant 0 : index
    %74 = vector.load %arg2[%c3_33, %73, %c0_34] : memref<14x16x128xf32, #tpu.memory_space<vmem>>, vector<1x16x128xf32>
    %75 = vector.shape_cast %74 : vector<1x16x128xf32> to vector<16x128xf32>
    %76 = arith.addf %14, %75 : vector<16x128xf32>
    %c4_35 = arith.constant 4 : index
    %77 = arith.index_cast %18 : i32 to index
    %c0_36 = arith.constant 0 : index
    %78 = vector.load %arg2[%c4_35, %77, %c0_36] : memref<14x16x128xf32, #tpu.memory_space<vmem>>, vector<1x16x128xf32>
    %79 = vector.shape_cast %78 : vector<1x16x128xf32> to vector<16x128xf32>
    %80 = arith.addf %16, %79 : vector<16x128xf32>
    %c1_i32 = arith.constant 1 : i32
    %c0_37 = arith.constant 0 : index
    %c0_38 = arith.constant 0 : index
    %c0_39 = arith.constant 0 : index
    %81 = vector.load %arg4[%c0_37, %c0_38, %c0_39] : memref<7x16x128xf32, #tpu.memory_space<vmem>>, vector<1x16x128xf32>
    %82 = vector.shape_cast %81 : vector<1x16x128xf32> to vector<16x128xf32>
    %83 = vector.shape_cast %61 : vector<16x128xf32> to vector<1x16x128xf32>
    tpu.vector_store %arg4[%c0_37, %c0_38, %c0_39], %83 {strides = array<i32>} : memref<7x16x128xf32, #tpu.memory_space<vmem>>, vector<1x16x128xf32>,
    %c1_40 = arith.constant 1 : index
    %c0_41 = arith.constant 0 : index
    %c0_42 = arith.constant 0 : index
    %84 = vector.load %arg4[%c1_40, %c0_41, %c0_42] : memref<7x16x128xf32, #tpu.memory_space<vmem>>, vector<1x16x128xf32>
    %85 = vector.shape_cast %84 : vector<1x16x128xf32> to vector<16x128xf32>
    %86 = vector.shape_cast %62 : vector<16x128xf32> to vector<1x16x128xf32>
    tpu.vector_store %arg4[%c1_40, %c0_41, %c0_42], %86 {strides = array<i32>} : memref<7x16x128xf32, #tpu.memory_space<vmem>>, vector<1x16x128xf32>,
    %c2_43 = arith.constant 2 : index
    %c0_44 = arith.constant 0 : index
    %c0_45 = arith.constant 0 : index
    %87 = vector.load %arg4[%c2_43, %c0_44, %c0_45] : memref<7x16x128xf32, #tpu.memory_space<vmem>>, vector<1x16x128xf32>
    %88 = vector.shape_cast %87 : vector<1x16x128xf32> to vector<16x128xf32>
    %89 = vector.shape_cast %66 : vector<16x128xf32> to vector<1x16x128xf32>
    tpu.vector_store %arg4[%c2_43, %c0_44, %c0_45], %89 {strides = array<i32>} : memref<7x16x128xf32, #tpu.memory_space<vmem>>, vector<1x16x128xf32>,
    %c3_46 = arith.constant 3 : index
    %c0_47 = arith.constant 0 : index
    %c0_48 = arith.constant 0 : index
    %90 = vector.load %arg4[%c3_46, %c0_47, %c0_48] : memref<7x16x128xf32, #tpu.memory_space<vmem>>, vector<1x16x128xf32>
    %91 = vector.shape_cast %90 : vector<1x16x128xf32> to vector<16x128xf32>
    %92 = vector.shape_cast %68 : vector<16x128xf32> to vector<1x16x128xf32>
    tpu.vector_store %arg4[%c3_46, %c0_47, %c0_48], %92 {strides = array<i32>} : memref<7x16x128xf32, #tpu.memory_space<vmem>>, vector<1x16x128xf32>,
    %c4_49 = arith.constant 4 : index
    %c0_50 = arith.constant 0 : index
    %c0_51 = arith.constant 0 : index
    %93 = vector.load %arg4[%c4_49, %c0_50, %c0_51] : memref<7x16x128xf32, #tpu.memory_space<vmem>>, vector<1x16x128xf32>
    %94 = vector.shape_cast %93 : vector<1x16x128xf32> to vector<16x128xf32>
    %95 = vector.shape_cast %72 : vector<16x128xf32> to vector<1x16x128xf32>
    tpu.vector_store %arg4[%c4_49, %c0_50, %c0_51], %95 {strides = array<i32>} : memref<7x16x128xf32, #tpu.memory_space<vmem>>, vector<1x16x128xf32>,
    %c5_52 = arith.constant 5 : index
    %c0_53 = arith.constant 0 : index
    %c0_54 = arith.constant 0 : index
    %96 = vector.load %arg4[%c5_52, %c0_53, %c0_54] : memref<7x16x128xf32, #tpu.memory_space<vmem>>, vector<1x16x128xf32>
    %97 = vector.shape_cast %96 : vector<1x16x128xf32> to vector<16x128xf32>
    %98 = vector.shape_cast %76 : vector<16x128xf32> to vector<1x16x128xf32>
    tpu.vector_store %arg4[%c5_52, %c0_53, %c0_54], %98 {strides = array<i32>} : memref<7x16x128xf32, #tpu.memory_space<vmem>>, vector<1x16x128xf32>,
    %c6_55 = arith.constant 6 : index
    %c0_56 = arith.constant 0 : index
    %c0_57 = arith.constant 0 : index
    %99 = vector.load %arg4[%c6_55, %c0_56, %c0_57] : memref<7x16x128xf32, #tpu.memory_space<vmem>>, vector<1x16x128xf32>
    %100 = vector.shape_cast %99 : vector<1x16x128xf32> to vector<16x128xf32>
    %101 = vector.shape_cast %80 : vector<16x128xf32> to vector<1x16x128xf32>
    tpu.vector_store %arg4[%c6_55, %c0_56, %c0_57], %101 {strides = array<i32>} : memref<7x16x128xf32, #tpu.memory_space<vmem>>, vector<1x16x128xf32>,
    %c0_i32_58 = arith.constant 0 : i32
    %102 = arith.cmpi eq, %arg0, %c0_i32_58 : i32
    %103 = arith.extui %102 : i1 to i32
    %c0_i32_59 = arith.constant 0 : i32
    %104 = arith.cmpi ne, %103, %c0_i32_59 : i32
    scf.if %104 {
      %c0_60 = arith.constant 0 : index
      %c0_61 = arith.constant 0 : index
      %c0_62 = arith.constant 0 : index
      %105 = vector.load %arg4[%c0_60, %c0_61, %c0_62] : memref<7x16x128xf32, #tpu.memory_space<vmem>>, vector<1x16x128xf32>
      %106 = vector.shape_cast %105 : vector<1x16x128xf32> to vector<16x128xf32>
      %107 = vector.shape_cast %106 : vector<16x128xf32> to vector<1x16x128xf32>
      %cst = arith.constant dense<0.000000e+00> : vector<1xf32>
      %108 = vector.multi_reduction <add>, %107, %cst [1, 2] : vector<1x16x128xf32> to vector<1xf32>
      %109 = vector.shape_cast %108 : vector<1xf32> to vector<1x1x1xf32>
      %110 = vector.extract %109[0, 0, 0] : f32 from vector<1x1x1xf32>
      %c1_63 = arith.constant 1 : index
      %c0_64 = arith.constant 0 : index
      %c0_65 = arith.constant 0 : index
      %111 = vector.load %arg4[%c1_63, %c0_64, %c0_65] : memref<7x16x128xf32, #tpu.memory_space<vmem>>, vector<1x16x128xf32>
      %112 = vector.shape_cast %111 : vector<1x16x128xf32> to vector<16x128xf32>
      %113 = vector.shape_cast %112 : vector<16x128xf32> to vector<1x16x128xf32>
      %cst_66 = arith.constant dense<0.000000e+00> : vector<1xf32>
      %114 = vector.multi_reduction <add>, %113, %cst_66 [1, 2] : vector<1x16x128xf32> to vector<1xf32>
      %115 = vector.shape_cast %114 : vector<1xf32> to vector<1x1x1xf32>
      %116 = vector.extract %115[0, 0, 0] : f32 from vector<1x1x1xf32>
      %c2_67 = arith.constant 2 : index
      %c0_68 = arith.constant 0 : index
      %c0_69 = arith.constant 0 : index
      %117 = vector.load %arg4[%c2_67, %c0_68, %c0_69] : memref<7x16x128xf32, #tpu.memory_space<vmem>>, vector<1x16x128xf32>
      %118 = vector.shape_cast %117 : vector<1x16x128xf32> to vector<16x128xf32>
      %119 = vector.shape_cast %118 : vector<16x128xf32> to vector<1x16x128xf32>
      %cst_70 = arith.constant dense<0.000000e+00> : vector<1xf32>
      %120 = vector.multi_reduction <add>, %119, %cst_70 [1, 2] : vector<1x16x128xf32> to vector<1xf32>
      %121 = vector.shape_cast %120 : vector<1xf32> to vector<1x1x1xf32>
      %122 = vector.extract %121[0, 0, 0] : f32 from vector<1x1x1xf32>
      %c3_71 = arith.constant 3 : index
      %c0_72 = arith.constant 0 : index
      %c0_73 = arith.constant 0 : index
      %123 = vector.load %arg4[%c3_71, %c0_72, %c0_73] : memref<7x16x128xf32, #tpu.memory_space<vmem>>, vector<1x16x128xf32>
      %124 = vector.shape_cast %123 : vector<1x16x128xf32> to vector<16x128xf32>
      %125 = vector.shape_cast %124 : vector<16x128xf32> to vector<1x16x128xf32>
      %cst_74 = arith.constant dense<0.000000e+00> : vector<1xf32>
      %126 = vector.multi_reduction <add>, %125, %cst_74 [1, 2] : vector<1x16x128xf32> to vector<1xf32>
      %127 = vector.shape_cast %126 : vector<1xf32> to vector<1x1x1xf32>
      %128 = vector.extract %127[0, 0, 0] : f32 from vector<1x1x1xf32>
      %c4_75 = arith.constant 4 : index
      %c0_76 = arith.constant 0 : index
      %c0_77 = arith.constant 0 : index
      %129 = vector.load %arg4[%c4_75, %c0_76, %c0_77] : memref<7x16x128xf32, #tpu.memory_space<vmem>>, vector<1x16x128xf32>
      %130 = vector.shape_cast %129 : vector<1x16x128xf32> to vector<16x128xf32>
      %131 = vector.shape_cast %130 : vector<16x128xf32> to vector<1x16x128xf32>
      %cst_78 = arith.constant dense<0.000000e+00> : vector<1xf32>
      %132 = vector.multi_reduction <add>, %131, %cst_78 [1, 2] : vector<1x16x128xf32> to vector<1xf32>
      %133 = vector.shape_cast %132 : vector<1xf32> to vector<1x1x1xf32>
      %134 = vector.extract %133[0, 0, 0] : f32 from vector<1x1x1xf32>
      %c5_79 = arith.constant 5 : index
      %c0_80 = arith.constant 0 : index
      %c0_81 = arith.constant 0 : index
      %135 = vector.load %arg4[%c5_79, %c0_80, %c0_81] : memref<7x16x128xf32, #tpu.memory_space<vmem>>, vector<1x16x128xf32>
      %136 = vector.shape_cast %135 : vector<1x16x128xf32> to vector<16x128xf32>
      %137 = vector.shape_cast %136 : vector<16x128xf32> to vector<1x16x128xf32>
      %cst_82 = arith.constant dense<0.000000e+00> : vector<1xf32>
      %138 = vector.multi_reduction <add>, %137, %cst_82 [1, 2] : vector<1x16x128xf32> to vector<1xf32>
      %139 = vector.shape_cast %138 : vector<1xf32> to vector<1x1x1xf32>
      %140 = vector.extract %139[0, 0, 0] : f32 from vector<1x1x1xf32>
      %c6_83 = arith.constant 6 : index
      %c0_84 = arith.constant 0 : index
      %c0_85 = arith.constant 0 : index
      %141 = vector.load %arg4[%c6_83, %c0_84, %c0_85] : memref<7x16x128xf32, #tpu.memory_space<vmem>>, vector<1x16x128xf32>
      %142 = vector.shape_cast %141 : vector<1x16x128xf32> to vector<16x128xf32>
      %143 = vector.shape_cast %142 : vector<16x128xf32> to vector<1x16x128xf32>
      %cst_86 = arith.constant dense<0.000000e+00> : vector<1xf32>
      %144 = vector.multi_reduction <add>, %143, %cst_86 [1, 2] : vector<1x16x128xf32> to vector<1xf32>
      %145 = vector.shape_cast %144 : vector<1xf32> to vector<1x1x1xf32>
      %146 = vector.extract %145[0, 0, 0] : f32 from vector<1x1x1xf32>
      %c0_87 = arith.constant 0 : index
      %147 = memref.load %arg1[%c0_87] : memref<1xi32, #tpu.memory_space<smem>>
      %148 = arith.sitofp %147 : i32 to f32
      %cst_88 = arith.constant 1.000000e+00 : f32
      %149 = arith.divf %cst_88, %148 : f32
      %cst_89 = arith.constant 9.99999974E-6 : f32
      %150 = arith.addf %116, %cst_89 : f32
      %151 = arith.divf %110, %150 : f32
      %cst_90 = arith.constant 1.000000e+00 : f32
      %152 = arith.mulf %cst_90, %151 : f32
      %cst_91 = arith.constant 1.000000e-01 : f32
      %153 = arith.mulf %cst_91, %122 : f32
      %154 = arith.mulf %153, %149 : f32
      %cst_92 = arith.constant 5.000000e-04 : f32
      %155 = arith.mulf %cst_92, %128 : f32
      %156 = arith.mulf %155, %149 : f32
      %cst_93 = arith.constant 1.000000e-01 : f32
      %157 = arith.mulf %cst_93, %134 : f32
      %158 = arith.mulf %157, %149 : f32
      %cst_94 = arith.constant 1.000000e-01 : f32
      %159 = arith.mulf %cst_94, %140 : f32
      %160 = arith.mulf %159, %149 : f32
      %cst_95 = arith.constant 1.000000e-01 : f32
      %161 = arith.mulf %cst_95, %146 : f32
      %162 = arith.mulf %161, %149 : f32
      %163 = tpu.iota {dimensions = array<i32: 1>} : vector<8x128xi32>
      %cst_96 = arith.constant 0.000000e+00 : f32
      %164 = vector.broadcast %cst_96 : f32 to vector<8x128xf32>
      %c0_i32_97 = arith.constant 0 : i32
      %165 = vector.broadcast %c0_i32_97 : i32 to vector<8x128xi32>
      %166 = arith.cmpi eq, %163, %165 : vector<8x128xi32>
      %167 = vector.broadcast %152 : f32 to vector<8x128xf32>
      %168 = arith.select %166, %167, %164 : vector<8x128xi1>, vector<8x128xf32>
      %c1_i32_98 = arith.constant 1 : i32
      %169 = vector.broadcast %c1_i32_98 : i32 to vector<8x128xi32>
      %170 = arith.cmpi eq, %163, %169 : vector<8x128xi32>
      %171 = vector.broadcast %154 : f32 to vector<8x128xf32>
      %172 = arith.select %170, %171, %168 : vector<8x128xi1>, vector<8x128xf32>
      %c2_i32 = arith.constant 2 : i32
      %173 = vector.broadcast %c2_i32 : i32 to vector<8x128xi32>
      %174 = arith.cmpi eq, %163, %173 : vector<8x128xi32>
      %175 = vector.broadcast %156 : f32 to vector<8x128xf32>
      %176 = arith.select %174, %175, %172 : vector<8x128xi1>, vector<8x128xf32>
      %c3_i32 = arith.constant 3 : i32
      %177 = vector.broadcast %c3_i32 : i32 to vector<8x128xi32>
      %178 = arith.cmpi eq, %163, %177 : vector<8x128xi32>
      %179 = vector.broadcast %158 : f32 to vector<8x128xf32>
      %180 = arith.select %178, %179, %176 : vector<8x128xi1>, vector<8x128xf32>
      %c4_i32 = arith.constant 4 : i32
      %181 = vector.broadcast %c4_i32 : i32 to vector<8x128xi32>
      %182 = arith.cmpi eq, %163, %181 : vector<8x128xi32>
      %183 = vector.broadcast %160 : f32 to vector<8x128xf32>
      %184 = arith.select %182, %183, %180 : vector<8x128xi1>, vector<8x128xf32>
      %c5_i32 = arith.constant 5 : i32
      %185 = vector.broadcast %c5_i32 : i32 to vector<8x128xi32>
      %186 = arith.cmpi eq, %163, %185 : vector<8x128xi32>
      %187 = vector.broadcast %162 : f32 to vector<8x128xf32>
      %188 = arith.select %186, %187, %184 : vector<8x128xi1>, vector<8x128xf32>
      %c0_99 = arith.constant 0 : index
      %c0_100 = arith.constant 0 : index
      %189 = vector.load %arg3[%c0_99, %c0_100] : memref<8x128xf32, #tpu.memory_space<vmem>>, vector<8x128xf32>
      tpu.vector_store %arg3[%c0_99, %c0_100], %188 {strides = array<i32>} : memref<8x128xf32, #tpu.memory_space<vmem>>, vector<8x128xf32>,
    } else {
    }
    return
  }
  func.func @transform_0(%arg0: i32, %arg1: memref<1xi32, #tpu.memory_space<smem>>) -> (i32, i32, i32) {
    %c0_i32 = arith.constant 0 : i32
    %c0_i32_0 = arith.constant 0 : i32
    %c0_i32_1 = arith.constant 0 : i32
    return %c0_i32, %arg0, %c0_i32_0 : i32, i32, i32
  }
  func.func @transform_1(%arg0: i32, %arg1: memref<1xi32, #tpu.memory_space<smem>>) -> (i32, i32) {
    %c0_i32 = arith.constant 0 : i32
    %c0_i32_0 = arith.constant 0 : i32
    %c0_i32_1 = arith.constant 0 : i32
    return %c0_i32, %c0_i32_0 : i32, i32
  }
}

</mosaic_0001>

<bundles_post_ra>
// kernel: tpu_custom_call.1
= control target key start
LH: loop header
LB: loop body
LE: loop exit
PB: predicated region body
PF: predicated region fallthrough
CT: control target
= control target key end

     0   :  { %8 = vsyncpa [#allocation6], 0  ;;  %s425_s0 = inlined_call_operand.<no memory space> [shape: s32[1], index: 0, kind: input, shape index: {}]   ;;  %s426_s1 = inlined_call_operand.hbm [shape: f32[14,16,128], index: 1, kind: input, shape index: {}]   ;;  %s427_s2 = inlined_call_operand.hbm [shape: f32[8,128], index: 2, kind: output, shape index: {}]  }
   0x1   :  { %9 = vsyncpa [#allocation7], 0  ;;  %s397_s9 = smov [#allocation5]  }
   0x2   :  { %s15_s10 = sshll.u32 %s397_s9, 4  ;;  %s16_s10 = int_to_ptr.vmem [resolvable:$true] %s15_s10 }
   0x3   :  { %s361_s11 = scalar_lea.vmem %s16_s10, 3584  ;;  %p366_p1 = scmp.lt.s32.totalorder %s16_s10, %s16_s10 }
   0x4   :  { %p362_p0 = scmp.ne.s32.totalorder %s16_s10, %s361_s11  ;;  %p367_p2 = scmp.lt.s32.totalorder %s361_s11, %s361_s11 }
   0x6   :  { %p368_p3 = por %p367_p2, %p366_p1 }
   0x8   :  { %p369_p4 = pnand %p368_p3, %p362_p0 }
   0xa   :  { %372 = shalt.err (!%p369_p4)
}
   0xb   :  { %s398_s12 = smov 128   ;;  %s399_s13 = smov 8  }
   0xc   :  { %21 = dma.hbm_to_vmem [thread:$0]  %s426_s1, 3584, %s16_s10, [#allocation6], %s398_s12, %s398_s12, %s399_s13  }
   0xd   :  { %393 = dma.done.wait [#allocation6], 3584  }
   0xe   :  { %394 = vsyncadd [#allocation6], 4294963712  ;;  %v63_v0 = vld [vmem:[#allocation5] sm:$0xff]  ;;  %v67_v1 = vld [vmem:[#allocation5 + $0x50] sm:$0xff]  ;;  %s259_s17 = scvt.s32.f32 %s425_s0  ;;  %s400_s10 = smov [#allocation8]  }
   0xf   :  { %v68_v2 = vld [vmem:[#allocation5 + $0x58] sm:$0xff]  ;;  %v71_v3 = vld [vmem:[#allocation5 + $0x80] sm:$0xff]  ;;  %v72_v4 = vld [vmem:[#allocation5 + $0x88] sm:$0xff]  ;;  %v121_v15 = vand.u32 2147483647, %v63_v0  ;;  %s305_s11 = sshll.u32 %s400_s10, 4  ;;  %s306_s11 = int_to_ptr.vmem [resolvable:$true] %s305_s11 }
  0x10   :  { %v73_v5 = vsub.f32 %v67_v1, %v71_v3  ;;  %v74_v6 = vsub.f32 %v68_v2, %v72_v4  ;;  %v79_v7 = vld [vmem:[#allocation5 + $0x60] sm:$0xff]  ;;  %v80_v8 = vld [vmem:[#allocation5 + $0x68] sm:$0xff]  ;;  %v83_v9 = vld [vmem:[#allocation5 + $0x90] sm:$0xff]  ;;  %s373_s12 = scalar_lea.vmem %s306_s11, 128  ;;  %p378_p6 = scmp.lt.s32.totalorder %s306_s11, %s306_s11 }
  0x11   :  { %v64_v10 = vld [vmem:[#allocation5 + $0x8] sm:$0xff]  ;;  %v84_v11 = vld [vmem:[#allocation5 + $0x98] sm:$0xff]  ;;  %v85_v12 = vsub.f32 %v79_v7, %v83_v9  ;;  %v93_v13 = vld [vmem:[#allocation5 + $0x70] sm:$0xff]  ;;  %p374_p5 = scmp.ne.s32.totalorder %s306_s11, %s373_s12  ;;  %p379_p7 = scmp.lt.s32.totalorder %s373_s12, %s373_s12 }
  0x12   :  { %v94_v14 = vld [vmem:[#allocation5 + $0x78] sm:$0xff]  ;;  %v75_v16 = vand.u32 2147483647, %v73_v5  ;;  %v76_v17 = vand.u32 2147483647, %v74_v6  ;;  %v86_v18 = vsub.f32 %v80_v8, %v84_v11  ;;  %v97_v19 = vld [vmem:[#allocation5 + $0xa0] sm:$0xff]  ;;  %v188_v53 = vadd.f32 %v64_v10, %v63_v0 }
  0x13   :  { %v98_v20 = vld [vmem:[#allocation5 + $0xa8] sm:$0xff]  ;;  %v87_v21 = vand.u32 2147483647, %v85_v12  ;;  %v99_v22 = vsub.f32 %v93_v13, %v97_v19  ;;  %v131_v24 = vld [vmem:[#allocation5 + $0x10] sm:$0xff]  ;;  %v132_v25 = vld [vmem:[#allocation5 + $0x18] sm:$0xff]  ;;  %p380_p8 = por %p379_p7, %p378_p6 }
  0x14   :  { %v100_v23 = vsub.f32 %v94_v14, %v98_v20  ;;  %v107_v26 = vld [vmem:[#allocation5 + $0xb0] sm:$0xff]  ;;  %v88_v27 = vand.u32 2147483647, %v86_v18  ;;  %v200_v28 = vadd.f32 %v132_v25, %v131_v24  ;;  %v108_v29 = vld [vmem:[#allocation5 + $0xb8] sm:$0xff]  ;;  %v111_v30 = vld [vmem:[#allocation5 + $0xc0] sm:$0xff]  ;;  %v260_v14 = vstv %s259_s17 }
  0x15   :  { %v112_v31 = vld [vmem:[#allocation5 + $0xc8] sm:$0xff]  ;;  %v89_v32 = vadd.f32 %v87_v21, %v75_v16  ;;  %v101_v33 = vand.u32 2147483647, %v99_v22  ;;  %v113_v35 = vadd.f32 %v111_v30, %v107_v26  ;;  %v117_v36 = vld [vmem:[#allocation5 + $0xd0] sm:$0xff]  ;;  %v118_v37 = vld [vmem:[#allocation5 + $0xd8] sm:$0xff]  ;;  %349 = vrcp.f32 %v260_v14  ;;  %p381_p9 = pnand %p380_p8, %p374_p5 }
  0x16   :  { %v102_v34 = vand.u32 2147483647, %v100_v23  ;;  %v90_v38 = vadd.f32 %v88_v27, %v76_v17  ;;  %v122_v39 = vand.u32 2147483647, %v64_v10  ;;  %201 = vadd.xlane.f32.xlu1 %v200_v28  ;;  %v114_v40 = vadd.f32 %v112_v31, %v108_v29  ;;  %v147_v49 = vld [vmem:[#allocation5 + $0x30] sm:$0xff]  ;;  %v148_v50 = vld [vmem:[#allocation5 + $0x38] sm:$0xff] }
  0x17   :  { %v103_v41 = vadd.f32 %v101_v33, %v89_v32  ;;  %v119_v42 = vadd.f32 %v117_v36, %v113_v35  ;;  %v236_v54 = vadd.f32 %v148_v50, %v147_v49  ;;  %v141_v55 = vld [vmem:[#allocation5 + $0x20] sm:$0xff]  ;;  %v142_v56 = vld [vmem:[#allocation5 + $0x28] sm:$0xff]  ;;  %v278_v50 = vlaneseq }
  0x18   :  { %v104_v43 = vadd.f32 %v102_v34, %v90_v38  ;;  %v120_v44 = vadd.f32 %v118_v37, %v114_v40  ;;  %v224_v57 = vadd.f32 %v142_v56, %v141_v55  ;;  %v153_v58 = vld [vmem:[#allocation5 + $0x40] sm:$0xff]  ;;  %v154_v59 = vld [vmem:[#allocation5 + $0x48] sm:$0xff] }
  0x19   :  { %v123_v45 = vmul.f32 %v121_v15, %v103_v41  ;;  %v135_v46 = vand.u32 2147483647, %v119_v42  ;;  %v248_v60 = vadd.f32 %v154_v59, %v153_v58 }
  0x1a   :  { %v124_v47 = vmul.f32 %v122_v39, %v104_v43  ;;  %v136_v48 = vand.u32 2147483647, %v120_v44 }
  0x1c   :  { %v176_v51 = vadd.f32 %v124_v47, %v123_v45  ;;  %v212_v52 = vadd.f32 %v136_v48, %v135_v46 }
  0x1e   :  { %177 = vadd.xlane.f32.xlu0 %v176_v51  ;;  %213 = vadd.xlane.f32.xlu1 %v212_v52  ;;  %v279_v51 = vand.u32 127, %v278_v50 }
  0x20   :  { %vm280_vm0 = vcmp.eq.s32.totalorder %v279_v51, 0  ;;  %vm283_vm1 = vcmp.eq.s32.totalorder %v279_v51, 1  ;;  %vm286_vm2 = vcmp.eq.s32.totalorder %v279_v51, 2  ;;  %vm289_vm3 = vcmp.eq.s32.totalorder %v279_v51, 3 }
  0x21   :  { %vm292_vm4 = vcmp.eq.s32.totalorder %v279_v51, 4  ;;  %vm295_vm5 = vcmp.eq.s32.totalorder %v279_v51, 5 }
  0x22   :  { %189 = vadd.xlane.f32.xlu0 %v188_v53  ;;  %237 = vadd.xlane.f32.xlu1 %v236_v54  ;;  %v350_v46 = vpop.eup %349 }
  0x26   :  { %225 = vadd.xlane.f32.xlu0 %v224_v57 }
  0x2a   :  { %249 = vadd.xlane.f32.xlu0 %v248_v60 }
  0x9f   :  { %v202_v61 = vpop.xlane.xlu1 %201 }
  0xa0   :  { %v203_v62 = vrot.slane %v202_v61, 4 }
  0xa2   :  { %v204_v63 = vadd.f32 %v203_v62, %v202_v61 }
  0xa4   :  { %v205_v0 = vrot.slane %v204_v63, 2 }
  0xa6   :  { %v206_v13 = vadd.f32 %v205_v0, %v204_v63 }
  0xa7   :  { %v178_v1 = vpop.xlane.xlu0 %177  ;;  %v214_v2 = vpop.xlane.xlu1 %213 }
  0xa8   :  { %v179_v3 = vrot.slane %v178_v1, 4  ;;  %v215_v4 = vrot.slane %v214_v2, 4  ;;  %v207_v24 = vrot.slane %v206_v13, 1 }
  0xaa   :  { %v180_v5 = vadd.f32 %v179_v3, %v178_v1  ;;  %v216_v6 = vadd.f32 %v215_v4, %v214_v2  ;;  %v208_v34 = vadd.f32 %v207_v24, %v206_v13 }
  0xab   :  { %v190_v7 = vpop.xlane.xlu0 %189  ;;  %v238_v8 = vpop.xlane.xlu1 %237 }
  0xac   :  { %v181_v9 = vrot.slane %v180_v5, 2  ;;  %v191_v10 = vrot.slane %v190_v7, 4  ;;  %v217_v11 = vrot.slane %v216_v6, 2  ;;  %v239_v12 = vrot.slane %v238_v8, 4 }
  0xae   :  { %v192_v15 = vadd.f32 %v191_v10, %v190_v7  ;;  %v182_v16 = vadd.f32 %v181_v9, %v180_v5  ;;  %v240_v17 = vadd.f32 %v239_v12, %v238_v8  ;;  %v218_v18 = vadd.f32 %v217_v11, %v216_v6 }
  0xaf   :  { %v226_v19 = vpop.xlane.xlu0 %225 }
  0xb0   :  { %v193_v20 = vrot.slane %v192_v15, 2  ;;  %v183_v21 = vrot.slane %v182_v16, 1  ;;  %v227_v22 = vrot.slane %v226_v19, 4  ;;  %v241_v23 = vrot.slane %v240_v17, 2 }
  0xb1   :  { %v219_v25 = vrot.slane %v218_v18, 1 }
  0xb2   :  { %v184_v26 = vadd.f32 %v183_v21, %v182_v16  ;;  %v194_v27 = vadd.f32 %v193_v20, %v192_v15  ;;  %v228_v28 = vadd.f32 %v227_v22, %v226_v19  ;;  %v242_v29 = vadd.f32 %v241_v23, %v240_v17 }
  0xb3   :  { %v250_v30 = vpop.xlane.xlu0 %249  ;;  %v220_v38 = vadd.f32 %v219_v25, %v218_v18 }
  0xb4   :  { %327 = vpush %v184_v26  ;;  %v195_v31 = vrot.slane %v194_v27, 1  ;;  %v229_v32 = vrot.slane %v228_v28, 2  ;;  %v251_v33 = vrot.slane %v250_v30, 4  ;;  %v243_v35 = vrot.slane %v242_v29, 1 }
  0xb6   :  { %v196_v36 = vadd.f32 %v195_v31, %v194_v27  ;;  %v252_v37 = vadd.f32 %v251_v33, %v250_v30  ;;  %v230_v39 = vadd.f32 %v229_v32, %v228_v28  ;;  %v244_v42 = vadd.f32 %v243_v35, %v242_v29 }
  0xb8   :  { %329 = vpush %v196_v36  ;;  %v253_v40 = vrot.slane %v252_v37, 2  ;;  %v231_v41 = vrot.slane %v230_v39, 1 }
  0xb9   :  { %331 = vpush %v208_v34 }
  0xba   :  { %v254_v43 = vadd.f32 %v253_v40, %v252_v37  ;;  %333 = vpush %v220_v38  ;;  %v232_v44 = vadd.f32 %v231_v41, %v230_v39 }
  0xbc   :  { %335 = vpush %v232_v44  ;;  %v255_v45 = vrot.slane %v254_v43, 1 }
  0xbd   :  { %337 = vpush %v244_v42 }
  0xbe   :  { %v256_v47 = vadd.f32 %v255_v45, %v254_v43 }
  0xc0   :  { %339 = vpush %v256_v47 }
  0xc1   :  { %341 = vpush %v350_v46 }
  0xe5   :  { %s328_s0 = spop %327 }
  0xe9   :  { %s330_s18 = spop %329 }
  0xea   :  { %s263_s19 = sadd.f32 1e-05, %s330_s18  ;;  %s332_s20 = spop %331 }
  0xeb   :  { %s334_s21 = spop %333  ;;  %s268_s24 = smul.f32 0.1, %s332_s20 }
  0xec   :  { %v264_v48 = vstv %s263_s19  ;;  %s270_s25 = smul.f32 0.0005, %s334_s21 }
  0xed   :  { %351 = vrcp.f32 %v264_v48  ;;  %s336_s22 = spop %335 }
  0xee   :  { %s338_s23 = spop %337  ;;  %s272_s27 = smul.f32 0.1, %s336_s22 }
  0xef   :  { %s274_s28 = smul.f32 0.1, %s338_s23 }
  0xf1   :  { %s340_s26 = spop %339 }
  0xf2   :  { %s342_s29 = spop %341  ;;  %s276_s30 = smul.f32 0.1, %s340_s26 }
  0xf3   :  { %s271_s3 = smul.f32 %s342_s29, %s270_s25 }
  0xf4   :  { %s269_s5 = smul.f32 %s342_s29, %s268_s24 }
  0xf5   :  { %s273_s7 = smul.f32 %s342_s29, %s272_s27  ;;  %v287_v56 = vstv %s271_s3 }
  0xf6   :  { %s275_s8 = smul.f32 %s342_s29, %s274_s28  ;;  %v284_v54 = vstv %s269_s5 }
  0xf7   :  { %s277_s9 = smul.f32 %s342_s29, %s276_s30  ;;  %v290_v57 = vstv %s273_s7 }
  0xf8   :  { %v293_v60 = vstv %s275_s8 }
  0xf9   :  { %v296_v62 = vstv %s277_s9 }
  0xfa   :  { %v352_v49 = vpop.eup %351 }
  0xfb   :  { %343 = vpush %v352_v49 }
 0x12c   :  { %s344_s4 = spop %343 }
 0x12d   :  { %s267_s6 = smul.f32 %s344_s4, %s328_s0 }
 0x12f   :  { %v281_v52 = vstv %s267_s6 }
 0x130   :  { %v282_v53 = vsel %vm280_vm0, %v281_v52, 0.0 }
 0x131   :  { %v285_v55 = vsel %vm283_vm1, %v284_v54, %v282_v53 }
 0x132   :  { %v288_v58 = vsel %vm286_vm2, %v287_v56, %v285_v55 }
 0x133   :  { %v291_v59 = vsel %vm289_vm3, %v290_v57, %v288_v58 }
 0x134   :  { %v294_v61 = vsel %vm292_vm4, %v293_v60, %v291_v59 }
 0x135   :  { %v297_v63 = vsel %vm295_vm5, %v296_v62, %v294_v61 }
 0x136   :  { %298 = vst [vmem:[#allocation8] sm:$0xff] %v297_v63 }
 0x137   :  { %384 = shalt.err (!%p381_p9)
}
 0x138   :  { %308 = dma.vmem_to_hbm [thread:$0]  %s306_s11, 128, %s427_s2, [#allocation7]  }
 0x139   :  { %395 = dma.done.wait [#allocation7], 128  }
 0x13a   :  { %396 = vsyncadd [#allocation7], 4294967168 }
 0x13b   :  { %312 = vsyncpa [#allocation6], 1 }
 0x13c   :  { %313 = vsyncpa [#allocation7], 1 }

</bundles_post_ra>
